<compile_context>
chip_gen: v7x
topology: tpu7x:2x2x1
jax: 0.10.0
libtpu: 0.0.40
codegen_flags: <defaults>
</compile_context>

<pallas_src>
import jax
import jax.numpy as jnp
from jax.experimental import pallas as pl
from jax.experimental.pallas import tpu as pltpu


def _frelu_kernel(x_ref, w_ref, scale_ref, shift_ref, o_ref):
    # x_ref:     (tile_c, H, W)   input channels block (batch dim squeezed)
    # w_ref:     (tile_c, 3, 3)   depthwise conv weights for these channels
    # scale_ref: (tile_c, 1, 1)   folded BN scale  = gamma / sqrt(var + eps)
    # shift_ref: (tile_c, 1, 1)   folded BN shift  = beta + scale*(conv_bias - mean)
    x = x_ref[...].astype(jnp.float32)
    w = w_ref[...].astype(jnp.float32)
    tc, H, W = x.shape

    # Zero-pad the spatial plane by 1 on each side (halo for the 3x3 window).
    zrow = jnp.zeros((tc, 1, W), jnp.float32)
    xp = jnp.concatenate([zrow, x, zrow], axis=1)          # (tc, H+2, W)
    zcol = jnp.zeros((tc, H + 2, 1), jnp.float32)
    xp = jnp.concatenate([zcol, xp, zcol], axis=2)         # (tc, H+2, W+2)

    # Depthwise 3x3 cross-correlation: 9 shifted multiply-adds (static unroll).
    acc = jnp.zeros_like(x)
    for ki in range(3):
        for kj in range(3):
            tap = w[:, ki:ki + 1, kj:kj + 1]               # (tc, 1, 1)
            acc = acc + tap * xp[:, ki:ki + H, kj:kj + W]

    # Folded (inference) BatchNorm + conv bias, then the FReLU max with x.
    y = acc * scale_ref[...].astype(jnp.float32) + shift_ref[...].astype(jnp.float32)
    o_ref[...] = jnp.maximum(x, y).astype(o_ref.dtype)


def frelu_nchw(x, conv_w, conv_b, gamma, beta, running_mean, running_var,
               eps=1e-5, *, block_bytes_target=2 * 1024 * 1024):
    """FReLU forward on NCHW input.

    x:       (B, C, H, W)
    conv_w:  (C, 1, 3, 3)   depthwise conv weight (PyTorch layout)
    conv_b:  (C,)           depthwise conv bias
    gamma, beta, running_mean, running_var: (C,)  BatchNorm2d parameters/stats
    """
    B, C, H, W = x.shape

    # Fold conv bias + inference-mode BN into per-channel scale/shift:
    #   BN(conv(x)+b) = scale*conv(x) + (beta + scale*(b - mean))
    scale = (gamma / jnp.sqrt(running_var + eps)).astype(jnp.float32)
    shift = (beta + scale * (conv_b - running_mean)).astype(jnp.float32)
    w3 = conv_w.reshape(C, 3, 3)

    # Pick the largest channel tile (divisor of C) whose input block stays
    # within the per-block byte target (keeps double-buffered in+out blocks
    # comfortably inside VMEM on v5e/v6e/v7x).
    plane_bytes = H * W * x.dtype.itemsize
    max_c = max(1, block_bytes_target // plane_bytes)
    tile_c = 1
    for d in range(1, C + 1):
        if C % d == 0 and d <= max_c:
            tile_c = d

    grid = (B, C // tile_c)

    return pl.pallas_call(
        _frelu_kernel,
        out_shape=jax.ShapeDtypeStruct((B, C, H, W), x.dtype),
        grid_spec=pltpu.PrefetchScalarGridSpec(
            num_scalar_prefetch=0,
            grid=grid,
            in_specs=[
                pl.BlockSpec((pl.Squeezed(), tile_c, H, W),
                             lambda b, c: (b, c, 0, 0)),
                pl.BlockSpec((tile_c, 3, 3), lambda b, c: (c, 0, 0)),
                pl.BlockSpec((tile_c, 1, 1), lambda b, c: (c, 0, 0)),
                pl.BlockSpec((tile_c, 1, 1), lambda b, c: (c, 0, 0)),
            ],
            out_specs=pl.BlockSpec((pl.Squeezed(), tile_c, H, W),
                                   lambda b, c: (b, c, 0, 0)),
        ),
        compiler_params=pltpu.CompilerParams(
            dimension_semantics=("parallel", "parallel"),
            vmem_limit_bytes=32 * 1024 * 1024,
        ),
    )(x, w3, scale.reshape(C, 1, 1), shift.reshape(C, 1, 1))


if __name__ == "__main__":
    key = jax.random.PRNGKey(0)
    B, C, H, W = 2, 4, 16, 16
    k1, k2, k3, k4, k5, k6, k7 = jax.random.split(key, 7)

    x = jax.random.normal(k1, (B, C, H, W), dtype=jnp.float32)
    conv_w = 0.3 * jax.random.normal(k2, (C, 1, 3, 3), dtype=jnp.float32)
    conv_b = 0.1 * jax.random.normal(k3, (C,), dtype=jnp.float32)
    gamma = 1.0 + 0.1 * jax.random.normal(k4, (C,), dtype=jnp.float32)
    beta = 0.1 * jax.random.normal(k5, (C,), dtype=jnp.float32)
    running_mean = 0.1 * jax.random.normal(k6, (C,), dtype=jnp.float32)
    running_var = jnp.abs(jax.random.normal(k7, (C,), dtype=jnp.float32)) + 0.5
    eps = 1e-5

    out = frelu_nchw(x, conv_w, conv_b, gamma, beta, running_mean, running_var, eps)
    out = jax.block_until_ready(out)

    # Pure-JAX reference (same semantics as the PyTorch forward, eval-mode BN).
    y = jax.lax.conv_general_dilated(
        x, conv_w, window_strides=(1, 1), padding=((1, 1), (1, 1)),
        dimension_numbers=("NCHW", "OIHW", "NCHW"), feature_group_count=C)
    y = y + conv_b[None, :, None, None]
    y = (y - running_mean[None, :, None, None]) / jnp.sqrt(
        running_var[None, :, None, None] + eps)
    y = y * gamma[None, :, None, None] + beta[None, :, None, None]
    ref = jnp.maximum(x, y)

    assert jnp.allclose(out, ref, atol=1e-4, rtol=1e-4), "mismatch vs reference"
    print("KERNEL_OK")
</pallas_src>

<mosaic_0001>
module attributes {stable_mosaic.version = 11 : i64} {
  func.func @_frelu_kernel(%arg0: i32, %arg1: i32, %arg2: memref<1x4x16x16xf32, #tpu.memory_space<vmem>>, %arg3: memref<4x3x3xf32, #tpu.memory_space<vmem>>, %arg4: memref<4x1x1xf32, #tpu.memory_space<vmem>>, %arg5: memref<4x1x1xf32, #tpu.memory_space<vmem>>, %arg6: memref<1x4x16x16xf32, #tpu.memory_space<vmem>>) attributes {dimension_semantics = [#tpu.dimension_semantics<parallel>, #tpu.dimension_semantics<parallel>], iteration_bounds = array<i64: 2, 1>, scalar_prefetch = 0 : i64, scratch_operands = 0 : i64, tpu.core_type = #tpu.core_type<tc>, window_params = [{transform_indices = @transform_0, window_bounds = array<i64: 1, 4, 16, 16>}, {transform_indices = @transform_1, window_bounds = array<i64: 4, 3, 3>}, {transform_indices = @transform_2, window_bounds = array<i64: 4, 1, 1>}, {transform_indices = @transform_3, window_bounds = array<i64: 4, 1, 1>}, {transform_indices = @transform_4, window_bounds = array<i64: 1, 4, 16, 16>}]} {
    %c0 = arith.constant 0 : index
    %c0_0 = arith.constant 0 : index
    %c0_1 = arith.constant 0 : index
    %c0_2 = arith.constant 0 : index
    %0 = vector.load %arg2[%c0, %c0_0, %c0_1, %c0_2] : memref<1x4x16x16xf32, #tpu.memory_space<vmem>>, vector<1x4x16x16xf32>
    %1 = vector.shape_cast %0 : vector<1x4x16x16xf32> to vector<4x16x16xf32>
    %c0_3 = arith.constant 0 : index
    %c0_4 = arith.constant 0 : index
    %c0_5 = arith.constant 0 : index
    %2 = vector.load %arg3[%c0_3, %c0_4, %c0_5] : memref<4x3x3xf32, #tpu.memory_space<vmem>>, vector<4x3x3xf32>
    %cst = arith.constant 0.000000e+00 : f32
    %3 = vector.broadcast %cst : f32 to vector<4x1x16xf32>
    %4 = tpu.concatenate %3, %1, %3 in 1 : vector<4x1x16xf32>, vector<4x16x16xf32>, vector<4x1x16xf32> -> vector<4x18x16xf32>
    %cst_6 = arith.constant 0.000000e+00 : f32
    %5 = vector.broadcast %cst_6 : f32 to vector<4x18x1xf32>
    %6 = tpu.concatenate %5, %4, %5 in 2 : vector<4x18x1xf32>, vector<4x18x16xf32>, vector<4x18x1xf32> -> vector<4x18x18xf32>
    %cst_7 = arith.constant 0.000000e+00 : f32
    %7 = vector.broadcast %cst_7 : f32 to vector<4x16x16xf32>
    %8 = vector.extract_strided_slice %2 {offsets = [0, 0, 0], sizes = [4, 1, 1], strides = [1, 1, 1]} : vector<4x3x3xf32> to vector<4x1x1xf32>
    %9 = vector.extract_strided_slice %6 {offsets = [0, 0, 0], sizes = [4, 16, 16], strides = [1, 1, 1]} : vector<4x18x18xf32> to vector<4x16x16xf32>
    %10 = vector.broadcast %8 : vector<4x1x1xf32> to vector<4x16x16xf32>
    %11 = arith.mulf %10, %9 : vector<4x16x16xf32>
    %12 = arith.addf %7, %11 : vector<4x16x16xf32>
    %13 = vector.extract_strided_slice %2 {offsets = [0, 0, 1], sizes = [4, 1, 1], strides = [1, 1, 1]} : vector<4x3x3xf32> to vector<4x1x1xf32>
    %14 = vector.extract_strided_slice %6 {offsets = [0, 0, 1], sizes = [4, 16, 16], strides = [1, 1, 1]} : vector<4x18x18xf32> to vector<4x16x16xf32>
    %15 = vector.broadcast %13 : vector<4x1x1xf32> to vector<4x16x16xf32>
    %16 = arith.mulf %15, %14 : vector<4x16x16xf32>
    %17 = arith.addf %12, %16 : vector<4x16x16xf32>
    %18 = vector.extract_strided_slice %2 {offsets = [0, 0, 2], sizes = [4, 1, 1], strides = [1, 1, 1]} : vector<4x3x3xf32> to vector<4x1x1xf32>
    %19 = vector.extract_strided_slice %6 {offsets = [0, 0, 2], sizes = [4, 16, 16], strides = [1, 1, 1]} : vector<4x18x18xf32> to vector<4x16x16xf32>
    %20 = vector.broadcast %18 : vector<4x1x1xf32> to vector<4x16x16xf32>
    %21 = arith.mulf %20, %19 : vector<4x16x16xf32>
    %22 = arith.addf %17, %21 : vector<4x16x16xf32>
    %23 = vector.extract_strided_slice %2 {offsets = [0, 1, 0], sizes = [4, 1, 1], strides = [1, 1, 1]} : vector<4x3x3xf32> to vector<4x1x1xf32>
    %24 = vector.extract_strided_slice %6 {offsets = [0, 1, 0], sizes = [4, 16, 16], strides = [1, 1, 1]} : vector<4x18x18xf32> to vector<4x16x16xf32>
    %25 = vector.broadcast %23 : vector<4x1x1xf32> to vector<4x16x16xf32>
    %26 = arith.mulf %25, %24 : vector<4x16x16xf32>
    %27 = arith.addf %22, %26 : vector<4x16x16xf32>
    %28 = vector.extract_strided_slice %2 {offsets = [0, 1, 1], sizes = [4, 1, 1], strides = [1, 1, 1]} : vector<4x3x3xf32> to vector<4x1x1xf32>
    %29 = vector.extract_strided_slice %6 {offsets = [0, 1, 1], sizes = [4, 16, 16], strides = [1, 1, 1]} : vector<4x18x18xf32> to vector<4x16x16xf32>
    %30 = vector.broadcast %28 : vector<4x1x1xf32> to vector<4x16x16xf32>
    %31 = arith.mulf %30, %29 : vector<4x16x16xf32>
    %32 = arith.addf %27, %31 : vector<4x16x16xf32>
    %33 = vector.extract_strided_slice %2 {offsets = [0, 1, 2], sizes = [4, 1, 1], strides = [1, 1, 1]} : vector<4x3x3xf32> to vector<4x1x1xf32>
    %34 = vector.extract_strided_slice %6 {offsets = [0, 1, 2], sizes = [4, 16, 16], strides = [1, 1, 1]} : vector<4x18x18xf32> to vector<4x16x16xf32>
    %35 = vector.broadcast %33 : vector<4x1x1xf32> to vector<4x16x16xf32>
    %36 = arith.mulf %35, %34 : vector<4x16x16xf32>
    %37 = arith.addf %32, %36 : vector<4x16x16xf32>
    %38 = vector.extract_strided_slice %2 {offsets = [0, 2, 0], sizes = [4, 1, 1], strides = [1, 1, 1]} : vector<4x3x3xf32> to vector<4x1x1xf32>
    %39 = vector.extract_strided_slice %6 {offsets = [0, 2, 0], sizes = [4, 16, 16], strides = [1, 1, 1]} : vector<4x18x18xf32> to vector<4x16x16xf32>
    %40 = vector.broadcast %38 : vector<4x1x1xf32> to vector<4x16x16xf32>
    %41 = arith.mulf %40, %39 : vector<4x16x16xf32>
    %42 = arith.addf %37, %41 : vector<4x16x16xf32>
    %43 = vector.extract_strided_slice %2 {offsets = [0, 2, 1], sizes = [4, 1, 1], strides = [1, 1, 1]} : vector<4x3x3xf32> to vector<4x1x1xf32>
    %44 = vector.extract_strided_slice %6 {offsets = [0, 2, 1], sizes = [4, 16, 16], strides = [1, 1, 1]} : vector<4x18x18xf32> to vector<4x16x16xf32>
    %45 = vector.broadcast %43 : vector<4x1x1xf32> to vector<4x16x16xf32>
    %46 = arith.mulf %45, %44 : vector<4x16x16xf32>
    %47 = arith.addf %42, %46 : vector<4x16x16xf32>
    %48 = vector.extract_strided_slice %2 {offsets = [0, 2, 2], sizes = [4, 1, 1], strides = [1, 1, 1]} : vector<4x3x3xf32> to vector<4x1x1xf32>
    %49 = vector.extract_strided_slice %6 {offsets = [0, 2, 2], sizes = [4, 16, 16], strides = [1, 1, 1]} : vector<4x18x18xf32> to vector<4x16x16xf32>
    %50 = vector.broadcast %48 : vector<4x1x1xf32> to vector<4x16x16xf32>
    %51 = arith.mulf %50, %49 : vector<4x16x16xf32>
    %52 = arith.addf %47, %51 : vector<4x16x16xf32>
    %c0_8 = arith.constant 0 : index
    %c0_9 = arith.constant 0 : index
    %c0_10 = arith.constant 0 : index
    %53 = vector.load %arg4[%c0_8, %c0_9, %c0_10] : memref<4x1x1xf32, #tpu.memory_space<vmem>>, vector<4x1x1xf32>
    %54 = vector.broadcast %53 : vector<4x1x1xf32> to vector<4x16x16xf32>
    %55 = arith.mulf %52, %54 : vector<4x16x16xf32>
    %c0_11 = arith.constant 0 : index
    %c0_12 = arith.constant 0 : index
    %c0_13 = arith.constant 0 : index
    %56 = vector.load %arg5[%c0_11, %c0_12, %c0_13] : memref<4x1x1xf32, #tpu.memory_space<vmem>>, vector<4x1x1xf32>
    %57 = vector.broadcast %56 : vector<4x1x1xf32> to vector<4x16x16xf32>
    %58 = arith.addf %55, %57 : vector<4x16x16xf32>
    %59 = arith.maximumf %1, %58 : vector<4x16x16xf32>
    %c0_14 = arith.constant 0 : index
    %c0_15 = arith.constant 0 : index
    %c0_16 = arith.constant 0 : index
    %c0_17 = arith.constant 0 : index
    %60 = vector.load %arg6[%c0_14, %c0_15, %c0_16, %c0_17] : memref<1x4x16x16xf32, #tpu.memory_space<vmem>>, vector<1x4x16x16xf32>
    %61 = vector.shape_cast %60 : vector<1x4x16x16xf32> to vector<4x16x16xf32>
    %62 = vector.shape_cast %59 : vector<4x16x16xf32> to vector<1x4x16x16xf32>
    tpu.vector_store %arg6[%c0_14, %c0_15, %c0_16, %c0_17], %62 {strides = array<i32>} : memref<1x4x16x16xf32, #tpu.memory_space<vmem>>, vector<1x4x16x16xf32>,
    return
  }
  func.func @transform_0(%arg0: i32, %arg1: i32) -> (i32, i32, i32, i32) {
    %c0_i32 = arith.constant 0 : i32
    %c0_i32_0 = arith.constant 0 : i32
    %c0_i32_1 = arith.constant 0 : i32
    return %arg0, %arg1, %c0_i32, %c0_i32_0 : i32, i32, i32, i32
  }
  func.func @transform_1(%arg0: i32, %arg1: i32) -> (i32, i32, i32) {
    %c0_i32 = arith.constant 0 : i32
    %c0_i32_0 = arith.constant 0 : i32
    %c0_i32_1 = arith.constant 0 : i32
    return %arg1, %c0_i32, %c0_i32_0 : i32, i32, i32
  }
  func.func @transform_2(%arg0: i32, %arg1: i32) -> (i32, i32, i32) {
    %c0_i32 = arith.constant 0 : i32
    %c0_i32_0 = arith.constant 0 : i32
    %c0_i32_1 = arith.constant 0 : i32
    return %arg1, %c0_i32, %c0_i32_0 : i32, i32, i32
  }
  func.func @transform_3(%arg0: i32, %arg1: i32) -> (i32, i32, i32) {
    %c0_i32 = arith.constant 0 : i32
    %c0_i32_0 = arith.constant 0 : i32
    %c0_i32_1 = arith.constant 0 : i32
    return %arg1, %c0_i32, %c0_i32_0 : i32, i32, i32
  }
  func.func @transform_4(%arg0: i32, %arg1: i32) -> (i32, i32, i32, i32) {
    %c0_i32 = arith.constant 0 : i32
    %c0_i32_0 = arith.constant 0 : i32
    %c0_i32_1 = arith.constant 0 : i32
    return %arg0, %arg1, %c0_i32, %c0_i32_0 : i32, i32, i32, i32
  }
}

</mosaic_0001>

<bundles_post_ra>
// kernel: tpu_custom_call.1
= control target key start
LH: loop header
LB: loop body
LE: loop exit
PB: predicated region body
PF: predicated region fallthrough
CT: control target
= control target key end

     0   :  { %9 = vsyncpa [#allocation3], 0  ;;  %s2685_s0 = inlined_call_operand.hbm [shape: f32[2,4,16,16], index: 0, kind: input, shape index: {}]   ;;  %s2686_s1 = inlined_call_operand.vmem [shape: f32[4,3,3], index: 1, kind: input, shape index: {}]   ;;  %s2687_s2 = inlined_call_operand.vmem [shape: f32[4,1,1], index: 2, kind: input, shape index: {}]   ;;  %s2688_s3 = inlined_call_operand.vmem [shape: f32[4,1,1], index: 3, kind: input, shape index: {}]   ;;  %s2689_s4 = inlined_call_operand.hbm [shape: f32[2,4,16,16], index: 4, kind: output, shape index: {}]  }
   0x1   :  { %11 = vsyncpa [#allocation3 + $0x1], 0 }
   0x2   :  { %12 = vsyncpa [#allocation4], 0 }
   0x3   :  { %14 = vsyncpa [#allocation4 + $0x1], 0  ;;  %s1707_s15 = smov 0   ;;  %s1709_s16 = smov 0  }
   0x4   :  { %s1711_s17 = smov 0   ;;  %s1713_s18 = smov 0  }
   0x5   :  { %s1715_s19 = smov 0   ;;  %s1717_s20 = smov 0  }
   0x6 LB: > { %s1378_s21 = sadd.s32 4294967295, %s1670_s20   ;;  %s1379_s22 = sadd.s32 4294967294, %s1670_s20   ;;  %s1670_s20 = sphi %s1717_s20, %s20_s20   ;;  %s1666_s19 = sphi %s1715_s19, %s2776_s19   ;;  %s1662_s18 = sphi %s1713_s18, %s2775_s18   ;;  %s1658_s17 = sphi %s1711_s17, %s2774_s17   ;;  %s1654_s16 = sphi %s1709_s16, %s2773_s16   ;;  %s1650_s15 = sphi %s1707_s15, %s2772_s15  }
   0x7   : > { %s32_s23 = sadd.s32 1, %s1666_s19  ;;  %s41_s24 = sadd.s32 1, %s1658_s17 }
   0x8   : > { %p34_p0 = scmp.ge.s32.totalorder %s32_s23, 2  ;;  %p48_p1 = scmp.ne.s32.totalorder %s1658_s17, %s1654_s16 }
   0x9   : > { %p49_p2 = scmp.eq.s32.totalorder %s1670_s20, 0  ;;  %p54_p3 = scmp.ne.s32.totalorder %s1654_s16, %s1650_s15 }
   0xa   : > { %s2778_s23 = smov (%p34_p0, %s32_s23), 0  ;;  %p55_p5 = scmp.eq.s32.totalorder %s1378_s21, 0 }
   0xb   : > { %p1748_p4 = por %p49_p2, %p48_p1  ;;  %s36_s26 = ssub.s32 %s1666_s19, %s2778_s23 }
   0xc   : > { %p158_p6 = scmp.eq.s32.totalorder %s1378_s21, 1  ;;  %p39_p7 = scmp.eq.s32.totalorder %s36_s26, 0 }
   0xd   : > { %p1754_p8 = por %p55_p5, %p54_p3  ;;  %p164_p10 = scmp.eq.s32.totalorder %s1379_s22, 1 }
   0xe   : > { %p1758_p9 = por %p158_p6, %p48_p1  ;;  %p1490_p13 = scmp.lt.s32.totalorder %s1670_s20, 2 }
   0xf   : > { %s1763_s29 = scalar_select %p39_p7, %s1658_s17, %s41_s24  }
  0x10   : > { %s2708_s28 = scalar_select %p1758_p9, 1, 0 }
  0x11   : > { %p1765_p11 = por %p164_p10, %p54_p3  ;;  %s209_s5 = sand.u32 1, %s1658_s17  }
  0x12   : > { %s1385_s6 = sshll.u32 %s209_s5, 6  ;;  %s1404_s7 = sshll.u32 %s1666_s19, 10 }
  0x13   : > { %s2709_s30 = scalar_select %p1765_p11, 1, 0 }
  0x14   : > { %s1776_s10 = scalar_lea.hbm %s2685_s0, %s1404_s7  ;;  %s213_s11 = scalar_lea.vmem [#allocation2], %s1385_s6 }
  0x15   : > { %s223_s12 = sshll.u32 %s213_s11, 4  ;;  %p1782_p0 = pnand %p1490_p13, %p1748_p4  ;;  %s1778_s12 = int_to_ptr.vmem [resolvable:$true] %s223_s12 }
  0x16   : > { %s1787_s14 = scalar_lea.sflag [#allocation3], %s209_s5  ;;  %s1558_s21 = scalar_lea.hbm %s1776_s10, 1024 }
  0x17   : > { %p1559_p2 = scmp.ne.s32.totalorder %s1776_s10, %s1558_s21  ;;  %p1560_p3 = pneg %p1782_p0 }
  0x18   : > { %s1563_s25 = scalar_lea.hbm %s2685_s0, 2048  ;;  %p1564_p4 = scmp.lt.u32.totalorder %s1776_s10, %s2685_s0 }
  0x19   : > { %p1561_p5 = pnand %p1560_p3, %p1559_p2  ;;  %p1565_p7 = scmp.lt.u32.totalorder %s1563_s25, %s1558_s21 }
  0x1a   : > { %p1567_p13 = scmp.lt.u32.totalorder %s1558_s21, %s1776_s10 }
  0x1b   : > { %p1562_p6 = pneg %p1561_p5  ;;  %p1566_p10 = por %p1565_p7, %p1564_p4 }
  0x1d   : > { %p1568_p12 = por %p1567_p13, %p1566_p10 }
  0x1f   : > { %p1569_p1 = pnand %p1568_p12, %p1562_p6 }
  0x21   : > { %1572 = shalt.err (!%p1569_p1)
}
  0x22   : > { %s1573_s5 = scalar_lea.vmem %s1778_s12, 1024  ;;  %s1672_s7 = smov [#allocation2]  }
  0x23   : > { %p1574_p2 = scmp.ne.s32.totalorder %s1778_s12, %s1573_s5  ;;  %s1578_s8 = sshll.u32 %s1672_s7, 4  ;;  %s1579_s8 = int_to_ptr.vmem [resolvable:$false] %s1578_s8 }
  0x24   : > { %s1580_s9 = scalar_lea.vmem %s1579_s8, 2048  ;;  %p1581_p9 = scmp.lt.s32.totalorder %s1778_s12, %s1579_s8 }
  0x25   : > { %p1576_p5 = pnand %p1574_p2, %p1560_p3  ;;  %p1582_p4 = scmp.lt.s32.totalorder %s1580_s9, %s1573_s5 }
  0x27   : > { %p1577_p11 = pneg %p1576_p5  ;;  %p1583_p7 = por %p1582_p4, %p1581_p9 }
  0x29   : > { %p1584_p10 = pnand %p1583_p7, %p1577_p11 }
  0x2b   : > { %1587 = shalt.err (!%p1584_p10)
}
  0x2c   : > { %s1673_s11 = smov 128   ;;  %s1674_s21 = smov 8  }
  0x2d   : > { %1485 = dma.hbm_to_vmem [thread:$0]  (!%p1782_p0), %s1776_s10, 1024, %s1778_s12, %s1787_s14, %s1673_s11, %s1673_s11, %s1674_s21  }
  0x2e   : > { %p231_p12 = scmp.lt.s32.totalorder %s1670_s20, 3  ;;  %p2711_p1 = scmp.ge.s32.totalorder %s1670_s20, 1 }
  0x30   : > { %p232_p3 = pnand %p2711_p1, %p231_p12 }
  0x32   : > { %235 = sbr.rel (%p232_p3) target bundleno = 477 (0x1dd), region = 36 }
  0x39   : > { %s1819_s22 = sand.u32 1, %s1654_s16  }
  0x3a   : > { %s2691_s24 = sshll.u32 %s1819_s22, 6  ;;  %s238_s25 = scalar_lea.sflag [#allocation3], %s1819_s22 }
  0x3b   : > { %s1825_s26 = scalar_lea.vmem [#allocation2], %s2691_s24 }
  0x3c   : > { %1641 = dma.done.wait (%p1754_p8), %s238_s25, 1024  }
  0x3d   : > { %1643 = vsyncadd (%p1754_p8), %s238_s25, 4294966272  ;;  %vm317_vm0 = vcmask 1040384   ;;  %v306_v0 = vld [vmem:[%s2686_s1 + $0x4] sm:$0x7]  ;;  %v305_v1 = vld [vmem:[%s2686_s1] sm:$0x7] }
  0x3e   : > { %v298_v2 = vld [vmem:[%s1825_s26 + $0x8] sm:$0xff]  ;;  %s2692_s6 = smov 127   ;;  %v297_v4 = vld [vmem:[%s1825_s26] sm:$0xff]  ;;  %v299_v5 = vld [vmem:[%s1825_s26 + $0x10] sm:$0xff]  ;;  %1406 = vpush %v305_v1  ;;  %v1676_v9 = vmov 0   ;;  %s1677_s9 = smov 1  }
  0x3f   : > { %450 = vrot.lane.b32.xlu1 %v306_v0, %s2692_s6  ;;  %448 = vrot.lane.b32.xlu0 %v305_v1, %s2692_s6  ;;  %v319_v3 = vrot.slane %v298_v2, 7  ;;  %v318_v6 = vrot.slane %v297_v4, 7  ;;  %v321_v7 = vrot.slane %v299_v5, 7  ;;  %v307_v8 = vld [vmem:[%s2686_s1 + $0x8] sm:$0x7]  ;;  %1408 = vpush %v306_v0  ;;  %s2694_s11 = smov 126  }
  0x40   : > { %1549 = vset.pattern.permute.xlu1 %v1676_v9  ;;  %1548 = vset.pattern.permute.xlu0 %v1676_v9  ;;  %v308_v11 = vld [vmem:[%s2686_s1 + $0xc] sm:$0x7]  ;;  %1410 = vpush %v307_v8  ;;  %v1862_v15 = vrot.slane %v306_v0, 1  ;;  %v1864_v16 = vrot.slane %v305_v1, 1  ;;  %v1872_v18 = vrot.slane %v307_v8, 1  ;;  %v1886_v19 = vrot.slane %v306_v0, 2 }
  0x41   : > { %v342_v10 = vsel %vm317_vm0, %v319_v3, 0.0  ;;  %v338_v12 = vsel %vm317_vm0, 0.0, %v318_v6  ;;  %1412 = vpush %v308_v11  ;;  %v339_v13 = vsel %vm317_vm0, 0.0, %v321_v7  ;;  %v320_v14 = vsel %vm317_vm0, %v318_v6, %v319_v3  ;;  %v301_v23 = vld [vmem:[%s1825_s26 + $0x20] sm:$0xff]  ;;  %v300_v24 = vld [vmem:[%s1825_s26 + $0x18] sm:$0xff]  ;;  %v303_v27 = vld [vmem:[%s1825_s26 + $0x30] sm:$0xff] }
  0x42   : > { %v1870_v17 = vrot.slane %v308_v11, 1  ;;  %v1888_v20 = vrot.slane %v305_v1, 2  ;;  %v1894_v21 = vrot.slane %v308_v11, 2  ;;  %v1896_v22 = vrot.slane %v307_v8, 2  ;;  %v302_v28 = vld [vmem:[%s1825_s26 + $0x28] sm:$0xff]  ;;  %v304_v33 = vld [vmem:[%s1825_s26 + $0x38] sm:$0xff] }
  0x43   : > { %358 = vrot.lane.b32.xlu1 %v342_v10, %s1677_s9  ;;  %354 = vrot.lane.b32.xlu0 %v338_v12, %s1677_s9  ;;  %v324_v25 = vrot.slane %v301_v23, 7  ;;  %v322_v26 = vrot.slane %v300_v24, 7  ;;  %v327_v31 = vrot.slane %v303_v27, 7  ;;  %v325_v32 = vrot.slane %v302_v28, 7  ;;  %v1392_v41 = vld [vmem:[%s2687_s2 + $0x1] ss:$0 sm:$0xff] }
  0x44   : > { %v328_v36 = vrot.slane %v304_v33, 7  ;;  %v1391_v42 = vld [vmem:[%s2687_s2] ss:$0 sm:$0xff]  ;;  %v1393_v43 = vld [vmem:[%s2687_s2 + $0x2] ss:$0 sm:$0xff]  ;;  %vm390_vm1 = vcmask 7168  }
  0x45   : > { %v340_v29 = vsel %vm317_vm0, 0.0, %v324_v25  ;;  %v323_v30 = vsel %vm317_vm0, %v321_v7, %v322_v26  ;;  %v341_v34 = vsel %vm317_vm0, 0.0, %v327_v31  ;;  %v326_v35 = vsel %vm317_vm0, %v324_v25, %v325_v32  ;;  %v1394_v44 = vld [vmem:[%s2687_s2 + $0x3] ss:$0 sm:$0xff]  ;;  %v1395_v45 = vld [vmem:[%s2688_s3] ss:$0 sm:$0xff] }
  0x46   : > { %v329_v37 = vsel %vm317_vm0, %v327_v31, %v328_v36  ;;  %v343_v38 = vsel %vm317_vm0, %v322_v26, 0.0  ;;  %v345_v39 = vsel %vm317_vm0, %v328_v36, 0.0  ;;  %v344_v40 = vsel %vm317_vm0, %v325_v32, 0.0  ;;  %v1396_v46 = vld [vmem:[%s2688_s3 + $0x1] ss:$0 sm:$0xff]  ;;  %p2769_p9 = scmp.ne.s32.totalorder %s2708_s28, 0 }
  0x47   : > { %360 = vrot.lane.b32.xlu1 %v339_v13, %s1677_s9  ;;  %356 = vrot.lane.b32.xlu0 %v320_v14, %s1677_s9  ;;  %v1397_v47 = vld [vmem:[%s2688_s3 + $0x2] ss:$0 sm:$0xff]  ;;  %v1398_v48 = vld [vmem:[%s2688_s3 + $0x3] ss:$0 sm:$0xff]  ;;  %vm403_vm2 = vcmask 138240   ;;  %vm624_vm3 = vcmask 1046528  }
  0x48   : > { %vm893_vm4 = vcmask 1045504   ;;  %vm1226_vm5 = vcmask 130048  }
  0x4b   : > { %454 = vrot.lane.b32.xlu1 %v308_v11, %s2692_s6  ;;  %452 = vrot.lane.b32.xlu0 %v307_v8, %s2692_s6 }
  0x4f   : > { %518 = vrot.lane.b32.xlu1 %v306_v0, %s2694_s11  ;;  %516 = vrot.lane.b32.xlu0 %v305_v1, %s2694_s11 }
  0x53   : > { %522 = vrot.lane.b32.xlu1 %v308_v11, %s2694_s11  ;;  %520 = vrot.lane.b32.xlu0 %v307_v8, %s2694_s11 }
  0x57   : > { %663 = vrot.lane.b32.xlu1 %v1862_v15, %s2692_s6  ;;  %661 = vrot.lane.b32.xlu0 %v1864_v16, %s2692_s6 }
  0x5b   : > { %667 = vrot.lane.b32.xlu1 %v1870_v17, %s2692_s6  ;;  %665 = vrot.lane.b32.xlu0 %v1872_v18, %s2692_s6 }
  0x5f   : > { %759 = vrot.lane.b32.xlu1 %v1862_v15, %s2694_s11  ;;  %757 = vrot.lane.b32.xlu0 %v1864_v16, %s2694_s11 }
  0x63   : > { %763 = vrot.lane.b32.xlu1 %v1870_v17, %s2694_s11  ;;  %761 = vrot.lane.b32.xlu0 %v1872_v18, %s2694_s11 }
  0x67   : > { %932 = vrot.lane.b32.xlu1 %v1886_v19, %s2692_s6  ;;  %930 = vrot.lane.b32.xlu0 %v1888_v20, %s2692_s6 }
  0x6b   : > { %936 = vrot.lane.b32.xlu1 %v1894_v21, %s2692_s6  ;;  %934 = vrot.lane.b32.xlu0 %v1896_v22, %s2692_s6 }
  0x6f   : > { %1028 = vrot.lane.b32.xlu1 %v1886_v19, %s2694_s11  ;;  %1026 = vrot.lane.b32.xlu0 %v1888_v20, %s2694_s11  ;;  %s1967_s14 = spop %1406 }
  0x70   : > { %s1969_s27 = spop %1408 }
  0x71   : > { %s1971_s5 = spop %1410  ;;  %v2696_v28 = vstv %s1969_s27 }
  0x72   : > { %s1975_s7 = spop %1412 }
  0x73   : > { %1032 = vrot.lane.b32.xlu1 %v1894_v21, %s2694_s11  ;;  %1030 = vrot.lane.b32.xlu0 %v1896_v22, %s2694_s11 }
  0x77   : > { %366 = vrot.lane.b32.xlu1 %v340_v29, %s1677_s9  ;;  %362 = vrot.lane.b32.xlu0 %v323_v30, %s1677_s9  ;;  %v426_v29 = vstv %s1971_s5 }
  0x7b   : > { %372 = vrot.lane.b32.xlu1 %v341_v34, %s1677_s9  ;;  %368 = vrot.lane.b32.xlu0 %v326_v35, %s1677_s9 }
  0x7f   : > { %374 = vrot.lane.b32.xlu0 %v329_v37, %s1677_s9  ;;  %364 = vrot.lane.b32.xlu1 %v343_v38, %s1677_s9 }
  0x83   : > { %376 = vrot.lane.b32.xlu1 %v345_v39, %s1677_s9  ;;  %370 = vrot.lane.b32.xlu0 %v344_v40, %s1677_s9 }
  0x87   : > { %1151 = vperm.xlu1 %1549, %v1392_v41   ;;  %1147 = vperm.xlu0 %1548, %v1391_v42  }
  0x8b   : > { %1155 = vperm.xlu1 %1549, %v1393_v43   ;;  %1159 = vperm.xlu0 %1548, %v1394_v44  }
  0x8f   : > { %1195 = vperm.xlu1 %1549, %v1395_v45   ;;  %1199 = vperm.xlu0 %1548, %v1396_v46  }
  0x93   : > { %1203 = vperm.xlu1 %1549, %v1397_v47   ;;  %1207 = vperm.xlu0 %1548, %v1398_v48  }
  0xb1   : > { %v451_v49 = vpop.permute.xlu1 %450  ;;  %v449_v50 = vpop.permute.xlu0 %448 }
  0xb2   : > { %1414 = vpush %v449_v50 }
  0xb3   : > { %1416 = vpush %v451_v49 }
  0xb5   : > { %v1955_v51 = vpop.permute.xlu1 %358  ;;  %v355_v52 = vpop.permute.xlu0 %354 }
  0xb6   : > { %v391_v9 = vsel %vm390_vm1, 0.0, %v355_v52 }
  0xb7   : > { %v1978_v13 = vsel %vm403_vm2, %v391_v9, 0.0 }
  0xb9   : > { %v1957_v53 = vpop.permute.xlu1 %360  ;;  %v357_v54 = vpop.permute.xlu0 %356 }
  0xba   : > { %v392_v10 = vsel %vm390_vm1, 0.0, %v357_v54 }
  0xbb   : > { %v1981_v14 = vsel %vm403_vm2, %v392_v10, 0.0 }
  0xbd   : > { %v455_v55 = vpop.permute.xlu1 %454  ;;  %v453_v56 = vpop.permute.xlu0 %452 }
  0xbe   : > { %1418 = vpush %v453_v56  ;;  %v393_v56 = vsel %vm390_vm1, 0.0, %v1955_v51 }
  0xbf   : > { %1420 = vpush %v455_v55  ;;  %v2051_v51 = vsel %vm403_vm2, %v393_v56, 0.0 }
  0xc1   : > { %v519_v57 = vpop.permute.xlu1 %518  ;;  %v517_v58 = vpop.permute.xlu0 %516 }
  0xc2   : > { %1422 = vpush %v517_v58 }
  0xc3   : > { %1424 = vpush %v519_v57 }
  0xc5   : > { %v523_v59 = vpop.permute.xlu1 %522  ;;  %v521_v60 = vpop.permute.xlu0 %520 }
  0xc6   : > { %1426 = vpush %v521_v60 }
  0xc7   : > { %1428 = vpush %v523_v59 }
  0xc8   : > { %1430 = vpush %v1864_v16  ;;  %v394_v16 = vsel %vm390_vm1, 0.0, %v1957_v53 }
  0xc9   : > { %1432 = vpush %v1862_v15  ;;  %v664_v61 = vpop.permute.xlu1 %663  ;;  %v662_v62 = vpop.permute.xlu0 %661 }
  0xca   : > { %1434 = vpush %v1872_v18 }
  0xcb   : > { %1436 = vpush %v1870_v17 }
  0xcc   : > { %1438 = vpush %v662_v62 }
  0xcd   : > { %1440 = vpush %v664_v61  ;;  %v668_v63 = vpop.permute.xlu1 %667  ;;  %v666_v0 = vpop.permute.xlu0 %665 }
  0xce   : > { %1442 = vpush %v666_v0 }
  0xcf   : > { %1444 = vpush %v668_v63 }
  0xd1   : > { %v760_v1 = vpop.permute.xlu1 %759  ;;  %v758_v2 = vpop.permute.xlu0 %757 }
  0xd2   : > { %1446 = vpush %v758_v2 }
  0xd3   : > { %1448 = vpush %v760_v1 }
  0xd5   : > { %v764_v3 = vpop.permute.xlu1 %763  ;;  %v762_v4 = vpop.permute.xlu0 %761 }
  0xd6   : > { %1450 = vpush %v762_v4 }
  0xd7   : > { %1452 = vpush %v764_v3 }
  0xd8   : > { %1454 = vpush %v1888_v20 }
  0xd9   : > { %1456 = vpush %v1886_v19  ;;  %v933_v5 = vpop.permute.xlu1 %932  ;;  %v931_v6 = vpop.permute.xlu0 %930 }
  0xda   : > { %1458 = vpush %v1896_v22  ;;  %v1990_v22 = vsel %vm403_vm2, %v394_v16, 0.0 }
  0xdb   : > { %1460 = vpush %v1894_v21 }
  0xdc   : > { %1462 = vpush %v931_v6 }
  0xdd   : > { %1464 = vpush %v933_v5  ;;  %v937_v7 = vpop.permute.xlu1 %936  ;;  %v935_v8 = vpop.permute.xlu0 %934 }
  0xde   : > { %1466 = vpush %v935_v8 }
  0xdf   : > { %1468 = vpush %v937_v7 }
  0xe1   : > { %v1029_v11 = vpop.permute.xlu1 %1028  ;;  %v1027_v12 = vpop.permute.xlu0 %1026 }
  0xe2   : > { %1470 = vpush %v1027_v12 }
  0xe3   : > { %1472 = vpush %v1029_v11  ;;  %s1415_s8 = spop %1414 }
  0xe4   : > { %v457_v15 = vstv %s1415_s8  ;;  %s1417_s9 = spop %1416 }
  0xe5   : > { %v468_v17 = vmul.f32 %v457_v15, %v1978_v13  ;;  %v469_v18 = vmul.f32 %v457_v15, %v1981_v14  ;;  %v1033_v19 = vpop.permute.xlu1 %1032  ;;  %v1031_v20 = vpop.permute.xlu0 %1030  ;;  %v460_v21 = vstv %s1417_s9 }
  0xe6   : > { %1474 = vpush %v1031_v20  ;;  %v470_v23 = vmul.f32 %v460_v21, %v1990_v22 }
  0xe7   : > { %1476 = vpush %v1033_v19  ;;  %484 = vrot.lane.b32.xlu0 %v468_v17, %s2692_s6  ;;  %486 = vrot.lane.b32.xlu1 %v469_v18, %s2692_s6 }
  0xe9   : > { %v367_v24 = vpop.permute.xlu1 %366  ;;  %v363_v25 = vpop.permute.xlu0 %362 }
  0xea   : > { %v397_v26 = vsel %vm390_vm1, 0.0, %v367_v24  ;;  %v395_v27 = vsel %vm390_vm1, 0.0, %v363_v25 }
  0xeb   : > { %v1998_v30 = vsel %vm403_vm2, %v397_v26, 0.0  ;;  %v2001_v31 = vsel %vm403_vm2, %v395_v27, 0.0  ;;  %488 = vrot.lane.b32.xlu0 %v470_v23, %s2692_s6 }
  0xec   : > { %v471_v32 = vmul.f32 %v460_v21, %v2001_v31  ;;  %v2008_v33 = vmul.f32 %v2696_v28, %v2001_v31  ;;  %v2011_v34 = vmul.f32 %v426_v29, %v1998_v30 }
  0xed   : > { %v373_v35 = vpop.permute.xlu1 %372  ;;  %v369_v36 = vpop.permute.xlu0 %368 }
  0xee   : > { %2712 = vst [vmem:[#allocation8_spill] sm:$0xff] %v2008_v33  ;;  %2713 = vst [vmem:[#allocation9_spill] sm:$0xff] %v2011_v34  ;;  %v398_v37 = vsel %vm390_vm1, 0.0, %v369_v36  ;;  %490 = vrot.lane.b32.xlu1 %v471_v32, %s2692_s6  ;;  %v400_v38 = vsel %vm390_vm1, 0.0, %v373_v35 }
  0xef   : > { %v2017_v39 = vsel %vm403_vm2, %v398_v37, 0.0  ;;  %s1419_s21 = spop %1418  ;;  %v2025_v47 = vsel %vm403_vm2, %v400_v38, 0.0 }
  0xf0   : > { %v463_v40 = vstv %s1419_s21  ;;  %s1421_s25 = spop %1420  ;;  %v2020_v41 = vmul.f32 %v426_v29, %v2017_v39  ;;  %2715 = vst [vmem:[#allocation11_spill] sm:$0xff] %v2025_v47 }
  0xf1   : > { %v472_v42 = vmul.f32 %v463_v40, %v1998_v30  ;;  %v473_v43 = vmul.f32 %v463_v40, %v2017_v39  ;;  %v375_v44 = vpop.permute.xlu0 %374  ;;  %v365_v45 = vpop.permute.xlu1 %364  ;;  %v466_v46 = vstv %s1421_s25 }
  0xf2   : > { %2714 = vst [vmem:[#allocation10_spill] sm:$0xff] %v2020_v41  ;;  %v401_v48 = vsel %vm390_vm1, 0.0, %v375_v44  ;;  %v474_v50 = vmul.f32 %v466_v46, %v2025_v47  ;;  %v396_v53 = vsel %vm390_vm1, 0.0, %v365_v45 }
  0xf3   : > { %v2029_v49 = vsel %vm403_vm2, %v401_v48, 0.0  ;;  %492 = vrot.lane.b32.xlu0 %v472_v42, %s2692_s6  ;;  %s1423_s10 = spop %1422  ;;  %494 = vrot.lane.b32.xlu1 %v473_v43, %s2692_s6  ;;  %v2045_v58 = vsel %vm403_vm2, %v396_v53, 0.0 }
  0xf4   : > { %2716 = vst [vmem:[#allocation12_spill] sm:$0xff] %v2029_v49  ;;  %v475_v52 = vmul.f32 %v466_v46, %v2029_v49  ;;  %v525_v54 = vstv %s1423_s10  ;;  %s1425_s12 = spop %1424 }
  0xf5   : > { %v371_v55 = vpop.permute.xlu0 %370  ;;  %v377_v57 = vpop.permute.xlu1 %376  ;;  %v536_v59 = vmul.f32 %v525_v54, %v1978_v13  ;;  %v537_v60 = vmul.f32 %v525_v54, %v1981_v14  ;;  %v528_v62 = vstv %s1425_s12 }
  0xf6   : > { %v399_v61 = vsel %vm390_vm1, 0.0, %v371_v55  ;;  %v402_v63 = vsel %vm390_vm1, 0.0, %v377_v57  ;;  %v538_v7 = vmul.f32 %v528_v62, %v1990_v22  ;;  %v539_v8 = vmul.f32 %v528_v62, %v2001_v31 }
  0xf7   : > { %496 = vrot.lane.b32.xlu0 %v474_v50, %s2692_s6  ;;  %s2039_s13 = spop %1426  ;;  %498 = vrot.lane.b32.xlu1 %v475_v52, %s2692_s6  ;;  %v2060_v3 = vsel %vm403_vm2, %v399_v61, 0.0  ;;  %v2071_v9 = vsel %vm403_vm2, %v402_v63, 0.0 }
  0xf8   : > { %s2042_s5 = spop %1428  ;;  %2717 = vst [vmem:[#allocation13_spill] sm:$0xff] %v2060_v3  ;;  %2718 = vst [vmem:[#allocation14_spill] sm:$0xff] %v2071_v9  ;;  %v531_v11 = vstv %s2039_s13 }
  0xf9   : > { %s1431_s8 = spop %1430  ;;  %v540_v20 = vmul.f32 %v531_v11, %v1998_v30  ;;  %v541_v21 = vmul.f32 %v531_v11, %v2017_v39  ;;  %v534_v23 = vstv %s2042_s5 }
  0xfa   : > { %v589_v0 = vstv %s1431_s8  ;;  %s1433_s9 = spop %1432  ;;  %v542_v24 = vmul.f32 %v534_v23, %v2025_v47  ;;  %v543_v25 = vmul.f32 %v534_v23, %v2029_v49 }
  0xfb   : > { %v2055_v1 = vmul.f32 %v589_v0, %v2051_v51  ;;  %v592_v2 = vstv %s1433_s9  ;;  %s1435_s21 = spop %1434  ;;  %552 = vrot.lane.b32.xlu0 %v536_v59, %s2694_s11  ;;  %554 = vrot.lane.b32.xlu1 %v537_v60, %s2694_s11  ;;  %v2116_v26 = vmul.f32 %v589_v0, %v1978_v13  ;;  %v2119_v27 = vmul.f32 %v589_v0, %v1981_v14 }
  0xfc   : > { %v2063_v4 = vmul.f32 %v592_v2, %v2001_v31  ;;  %v2066_v5 = vmul.f32 %v592_v2, %v2045_v58  ;;  %v595_v6 = vstv %s1435_s21  ;;  %s1437_s25 = spop %1436  ;;  %v2124_v29 = vmul.f32 %v592_v2, %v1990_v22 }
  0xfd   : > { %v2074_v10 = vmul.f32 %v595_v6, %v1998_v30  ;;  %v2078_v12 = vmul.f32 %v595_v6, %v2017_v39  ;;  %s1439_s10 = spop %1438  ;;  %v2081_v15 = vmul.f32 %v595_v6, %v2060_v3  ;;  %v598_v16 = vstv %s1437_s25 }
  0xfe   : > { %v2086_v17 = vmul.f32 %v598_v16, %v2025_v47  ;;  %v2089_v18 = vmul.f32 %v598_v16, %v2029_v49  ;;  %v2092_v19 = vmul.f32 %v598_v16, %v2071_v9  ;;  %s2094_s12 = spop %1440  ;;  %v670_v32 = vstv %s1439_s10 }
  0xff   : > { %556 = vrot.lane.b32.xlu0 %v538_v7, %s2694_s11  ;;  %558 = vrot.lane.b32.xlu1 %v539_v8, %s2694_s11  ;;  %s2098_s13 = spop %1442  ;;  %v681_v37 = vmul.f32 %v670_v32, %v1978_v13  ;;  %v682_v38 = vmul.f32 %v670_v32, %v1981_v14  ;;  %v683_v40 = vmul.f32 %v670_v32, %v2051_v51  ;;  %v673_v56 = vstv %s2094_s12 }
 0x100   : > { %s2101_s8 = spop %1444  ;;  %v676_v62 = vstv %s2098_s13  ;;  %v684_v7 = vmul.f32 %v673_v56, %v1990_v22 }
 0x101   : > { %v705_v59 = vrot.slane %v681_v37, 1  ;;  %v706_v60 = vrot.slane %v682_v38, 1  ;;  %v708_v61 = vrot.slane %v683_v40, 1  ;;  %v2178_v32 = vmul.f32 %v676_v62, %v1998_v30 }
 0x102   : > { %v2187_v40 = vmul.f32 %v676_v62, %v2017_v39  ;;  %v710_v55 = vrot.slane %v684_v7, 1 }
 0x103   : > { %560 = vrot.lane.b32.xlu0 %v540_v20, %s2694_s11  ;;  %562 = vrot.lane.b32.xlu1 %v541_v21, %s2694_s11  ;;  %s2105_s9 = spop %1446  ;;  %v685_v20 = vmul.f32 %v673_v56, %v2001_v31  ;;  %v679_v21 = vstv %s2101_s8  ;;  %v707_v54 = vsel %vm624_vm3, %v705_v59, %v706_v60  ;;  %v715_v45 = vrot.slane %v2178_v32, 1 }
 0x104   : > { %s2109_s21 = spop %1448  ;;  %v766_v37 = vstv %s2105_s9  ;;  %v2196_v48 = vmul.f32 %v679_v21, %v2025_v47  ;;  %v2205_v50 = vmul.f32 %v679_v21, %v2071_v9  ;;  %v716_v46 = vrot.slane %v2187_v40, 1 }
 0x105   : > { %v769_v28 = vstv %s2109_s21  ;;  %v711_v7 = vrot.slane %v685_v20, 1  ;;  %v2213_v52 = vmul.f32 %v766_v37, %v1981_v14  ;;  %v2216_v44 = vmul.f32 %v766_v37, %v2051_v51 }
 0x106   : > { %v2227_v20 = vmul.f32 %v769_v28, %v2001_v31  ;;  %v723_v32 = vrot.slane %v2205_v50, 1 }
 0x107   : > { %564 = vrot.lane.b32.xlu0 %v542_v24, %s2694_s11  ;;  %s2112_s25 = spop %1450  ;;  %566 = vrot.lane.b32.xlu1 %v543_v25, %s2694_s11  ;;  %v686_v25 = vmul.f32 %v673_v56, %v2045_v58  ;;  %v709_v56 = vsel %vm624_vm3, %v706_v60, %v708_v61  ;;  %v720_v61 = vrot.slane %v2196_v48, 1  ;;  %v712_v50 = vsel %vm624_vm3, %v710_v55, %v711_v7 }
 0x108   : > { %s2121_s5 = spop %1452  ;;  %v772_v59 = vstv %s2112_s25  ;;  %v717_v48 = vsel %vm624_vm3, %v715_v45, %v716_v46 }
 0x109   : > { %s1455_s24 = spop %1454  ;;  %v2233_v35 = vmul.f32 %v772_v59, %v1998_v30  ;;  %v775_v36 = vstv %s2121_s5  ;;  %s2729_s5 = smov 126  }
 0x10a   : > { %s1457_s6 = spop %1456  ;;  %v2131_v42 = vstv %s1455_s24  ;;  %v2265_v55 = vmul.f32 %v775_v36, %v2025_v47 }
 0x10b   : > { %s1459_s11 = spop %1458  ;;  %v2142_v53 = vmul.f32 %v2131_v42, %v2051_v51  ;;  %v2147_v57 = vstv %s1457_s6 }
 0x10c   : > { %s1461_s24 = spop %1460  ;;  %v2152_v63 = vmul.f32 %v2147_v57, %v2001_v31  ;;  %v2156_v0 = vmul.f32 %v2147_v57, %v2045_v58  ;;  %v864_v2 = vstv %s1459_s11  ;;  %s2719_s11 = smov 127  }
 0x10d   : > { %v867_v6 = vstv %s1461_s24  ;;  %v2160_v8 = vmul.f32 %v864_v2, %v1998_v30  ;;  %v2163_v11 = vmul.f32 %v864_v2, %v2017_v39  ;;  %v2166_v16 = vmul.f32 %v864_v2, %v2060_v3  ;;  %s2184_s6 = spop %1462  ;;  %725 = vrot.lane.b32.xlu0 %v707_v54, %s2719_s11  ;;  %727 = vrot.lane.b32.xlu1 %v709_v56, %s2719_s11 }
 0x10e   : > { %v2171_v23 = vmul.f32 %v867_v6, %v2025_v47  ;;  %v2174_v24 = vmul.f32 %v867_v6, %v2029_v49  ;;  %v2182_v38 = vmul.f32 %v867_v6, %v2071_v9  ;;  %v2190_v2 = vmul.f32 %v676_v62, %v2060_v3  ;;  %s2202_s10 = spop %1464 }
 0x10f   : > { %v2199_v6 = vmul.f32 %v679_v21, %v2029_v49  ;;  %v2208_v62 = vmul.f32 %v766_v37, %v1978_v13  ;;  %s1467_s12 = spop %1466  ;;  %v2219_v54 = vmul.f32 %v769_v28, %v1990_v22  ;;  %v713_v21 = vrot.slane %v686_v25, 1 }
 0x110   : > { %v718_v60 = vrot.slane %v2190_v2, 1  ;;  %s1469_s13 = spop %1468  ;;  %v2230_v37 = vmul.f32 %v769_v28, %v2045_v58  ;;  %v2241_v2 = vmul.f32 %v772_v59, %v2017_v39  ;;  %v2249_v43 = vstv %s1467_s12 }
 0x111   : > { %v721_v25 = vrot.slane %v2199_v6, 1  ;;  %2720 = vst [vmem:[#allocation15_spill] sm:$0xff] %v2249_v43  ;;  %v2251_v34 = vstv %s1469_s13  ;;  %v714_v6 = vsel %vm624_vm3, %v711_v7, %v713_v21  ;;  %v2258_v56 = vmul.f32 %v772_v59, %v2060_v3  ;;  %729 = vrot.lane.b32.xlu0 %v712_v50, %s2719_s11  ;;  %s1679_s13 = smov [#allocation5]  }
 0x112   : > { %2721 = vst [vmem:[#allocation16_spill] sm:$0xff] %v2251_v34  ;;  %731 = vrot.lane.b32.xlu1 %v714_v6, %s2719_s11  ;;  %v2268_v7 = vmul.f32 %v775_v36, %v2029_v49  ;;  %v2272_v21 = vmul.f32 %v2131_v42, %v1978_v13  ;;  %v2275_v59 = vmul.f32 %v775_v36, %v2071_v9 }
 0x113   : > { %s2235_s8 = spop %1470  ;;  %v956_v50 = vmul.f32 %v2249_v43, %v1998_v30  ;;  %v2281_v6 = vmul.f32 %v2249_v43, %v2017_v39  ;;  %v959_v28 = vmul.f32 %v2251_v34, %v2025_v47  ;;  %v2287_v41 = vmul.f32 %v2251_v34, %v2029_v49 }
 0x114   : > { %s2247_s9 = spop %1472  ;;  %v719_v36 = vsel %vm624_vm3, %v716_v46, %v718_v60  ;;  %v870_v9 = vmul.f32 %v2131_v42, %v1981_v14  ;;  %v872_v43 = vmul.f32 %v2147_v57, %v1990_v22  ;;  %v894_v46 = vrot.slane %v2272_v21, 2 }
 0x115   : > { %733 = vrot.lane.b32.xlu0 %v717_v48, %s2719_s11  ;;  %v984_v42 = vrot.slane %v956_v50, 2  ;;  %v989_v45 = vrot.slane %v959_v28, 2  ;;  %v724_v3 = vsel %vm624_vm3, %v721_v25, %v723_v32  ;;  %v897_v50 = vrot.slane %v2142_v53, 2 }
 0x116   : > { %735 = vrot.lane.b32.xlu1 %v719_v36, %s2719_s11  ;;  %v900_v57 = vrot.slane %v2152_v63, 2  ;;  %v904_v28 = vrot.slane %v2160_v8, 2  ;;  %v2724_v63 = vrot.slane %v2208_v62, 1  ;;  %v907_v62 = vrot.slane %v2166_v16, 2 }
 0x117   : > { %s1475_s21 = spop %1474  ;;  %v2732_v16 = vrot.slane %v2230_v37, 1 }
 0x118   : > { %s1477_s25 = spop %1476  ;;  %v2291_v40 = vstv %s1475_s21 }
 0x119   : > { %2722 = vst [vmem:[#allocation17_spill] sm:$0xff] %v2291_v40  ;;  %v2300_v34 = vstv %s1477_s25  ;;  %v1052_v60 = vmul.f32 %v2291_v40, %v1998_v30  ;;  %v2308_v33 = vmul.f32 %v2291_v40, %v2017_v39  ;;  %v722_v30 = vsel %vm624_vm3, %v720_v61, %v721_v25 }
 0x11a   : > { %v1055_v48 = vmul.f32 %v2300_v34, %v2025_v47  ;;  %v2315_v36 = vmul.f32 %v2300_v34, %v2029_v49  ;;  %v895_v39 = vrot.slane %v870_v9, 2  ;;  %v899_v40 = vrot.slane %v872_v43, 2  ;;  %737 = vrot.lane.b32.xlu0 %v722_v30, %s2719_s11  ;;  %739 = vrot.lane.b32.xlu1 %v724_v3, %s2719_s11 }
 0x11b   : > { %v902_v47 = vrot.slane %v2156_v0, 2  ;;  %v1080_v49 = vrot.slane %v1052_v60, 2  ;;  %v1081_v21 = vrot.slane %v2308_v33, 2  ;;  %v905_v61 = vrot.slane %v2163_v11, 2 }
 0x11c   : > { %v939_v25 = vstv %s2184_s6  ;;  %v1085_v9 = vrot.slane %v1055_v48, 2  ;;  %v1086_v53 = vrot.slane %v2315_v36, 2  ;;  %v2723_v43 = vrot.slane %v2213_v52, 1 }
 0x11d   : > { %v2725_v3 = vrot.slane %v2216_v44, 1  ;;  %v2727_v60 = vrot.slane %v2281_v6, 2  ;;  %v2728_v48 = vrot.slane %v2287_v41, 2  ;;  %v910_v44 = vrot.slane %v2174_v24, 2 }
 0x11e   : > { %v803_v32 = vsel %vm624_vm3, %v2724_v63, %v2723_v43  ;;  %v2726_v0 = vmov %v2723_v43  ;;  %v909_v43 = vrot.slane %v2171_v23, 2  ;;  %v912_v52 = vrot.slane %v2182_v38, 2 }
 0x11f   : > { %v805_v8 = vsel %vm624_vm3, %v2726_v0, %v2725_v3  ;;  %v2343_v11 = vsel %vm893_vm4, %v984_v42, %v2727_v60  ;;  %v2348_v30 = vsel %vm893_vm4, %v989_v45, %v2728_v48  ;;  %821 = vrot.lane.b32.xlu0 %v803_v32, %s2729_s5  ;;  %v950_v42 = vmul.f32 %v939_v25, %v1978_v13 }
 0x120   : > { %823 = vrot.lane.b32.xlu1 %v805_v8, %s2729_s5  ;;  %v2730_v63 = vrot.slane %v2227_v20, 1  ;;  %v2731_v3 = vrot.slane %v2219_v54, 1  ;;  %v2370_v38 = vsel %vm893_vm4, %v1080_v49, %v1081_v21  ;;  %v2375_v32 = vsel %vm893_vm4, %v1085_v9, %v1086_v53 }
 0x121   : > { %v2734_v54 = vrot.slane %v2055_v1, 1  ;;  %v2735_v0 = vrot.slane %v2119_v27, 1  ;;  %v2737_v8 = vrot.slane %v2116_v26, 1  ;;  %v2738_v49 = vrot.slane %v2066_v5, 1 }
 0x122   : > { %v808_v45 = vsel %vm624_vm3, %v2731_v3, %v2730_v63  ;;  %v2733_v23 = vmov %v2730_v63  ;;  %v2739_v48 = vrot.slane %v2063_v4, 1  ;;  %v2741_v63 = vrot.slane %v2124_v29, 1 }
 0x123   : > { %v810_v24 = vsel %vm624_vm3, %v2733_v23, %v2732_v16  ;;  %v2382_v37 = vsel %vm624_vm3, %v2735_v0, %v2734_v54  ;;  %v2736_v20 = vmov %v2735_v0  ;;  %v2742_v27 = vrot.slane %v2081_v15, 1  ;;  %825 = vrot.lane.b32.xlu0 %v808_v45, %s2729_s5 }
 0x124   : > { %v2389_v60 = vsel %vm624_vm3, %v2737_v8, %v2736_v20  ;;  %v2396_v9 = vsel %vm624_vm3, %v2739_v48, %v2738_v49  ;;  %v2740_v1 = vmov %v2739_v48  ;;  %v2743_v26 = vrot.slane %v2078_v12, 1  ;;  %827 = vrot.lane.b32.xlu1 %v810_v24, %s2729_s5 }
 0x125   : > { %v2403_v3 = vsel %vm624_vm3, %v2741_v63, %v2740_v1  ;;  %v2745_v23 = vrot.slane %v2074_v10, 1  ;;  %v2746_v4 = vrot.slane %v2092_v19, 1  ;;  %v2747_v29 = vrot.slane %v2089_v18, 1  ;;  %v2755_v63 = vld [vmem:[#allocation13_spill] sm:$0xff] }
 0x126   : > { %v2410_v16 = vsel %vm624_vm3, %v2743_v26, %v2742_v27  ;;  %v2744_v5 = vmov %v2743_v26  ;;  %v817_v15 = vrot.slane %v2268_v7, 1  ;;  %v2749_v10 = vrot.slane %v2086_v17, 1  ;;  %v2756_v27 = vld [vmem:[#allocation15_spill] sm:$0xff] }
 0x127   : > { %v2417_v54 = vsel %vm624_vm3, %v2745_v23, %v2744_v5  ;;  %v2424_v0 = vsel %vm624_vm3, %v2747_v29, %v2746_v4  ;;  %v2748_v12 = vmov %v2747_v29  ;;  %v2437_v19 = vsel %vm893_vm4, %v894_v46, %v895_v39  ;;  %v2757_v29 = vld [vmem:[#allocation14_spill] sm:$0xff] }
 0x128   : > { %v2434_v20 = vsel %vm624_vm3, %v2749_v10, %v2748_v12  ;;  %v2440_v8 = vsel %vm893_vm4, %v895_v39, %v897_v50  ;;  %v2443_v49 = vsel %vm893_vm4, %v899_v40, %v900_v57  ;;  %v2446_v7 = vsel %vm893_vm4, %v900_v57, %v902_v47 }
 0x129   : > { %v2449_v45 = vsel %vm893_vm4, %v904_v28, %v905_v61  ;;  %v2452_v17 = vsel %vm893_vm4, %v905_v61, %v907_v62  ;;  %v951_v18 = vmul.f32 %v939_v25, %v1981_v14  ;;  %v952_v46 = vmul.f32 %v939_v25, %v2051_v51 }
 0x12a   : > { %v2457_v24 = vsel %vm893_vm4, %v909_v43, %v910_v44  ;;  %v2460_v39 = vsel %vm893_vm4, %v910_v44, %v912_v52  ;;  %v819_v40 = vrot.slane %v2275_v59, 1  ;;  %v942_v47 = vstv %s2202_s10 }
 0x12b   : > { %v2750_v57 = vrot.slane %v2241_v2, 1  ;;  %v2751_v50 = vrot.slane %v2233_v35, 1  ;;  %v2752_v61 = vrot.slane %v2258_v56, 1  ;;  %v974_v43 = vrot.slane %v950_v42, 2 }
 0x12c   : > { %v975_v44 = vrot.slane %v951_v18, 2  ;;  %v977_v59 = vrot.slane %v952_v46, 2  ;;  %v953_v52 = vmul.f32 %v942_v47, %v1990_v22  ;;  %v954_v48 = vmul.f32 %v942_v47, %v2001_v31 }
 0x12d   : > { %v813_v28 = vsel %vm624_vm3, %v2751_v50, %v2750_v57  ;;  %v2753_v62 = vmov %v2750_v57  ;;  %v955_v35 = vmul.f32 %v942_v47, %v2045_v58  ;;  %v2754_v1 = vrot.slane %v2265_v55, 1 }
 0x12e   : > { %v815_v25 = vsel %vm624_vm3, %v2753_v62, %v2752_v61  ;;  %829 = vrot.lane.b32.xlu0 %v813_v28, %s2729_s5  ;;  %v820_v2 = vsel %vm624_vm3, %v817_v15, %v819_v40  ;;  %v979_v42 = vrot.slane %v953_v52, 2  ;;  %v958_v26 = vmul.f32 %v2756_v27, %v2755_v63 }
 0x12f   : > { %831 = vrot.lane.b32.xlu1 %v815_v25, %s2729_s5  ;;  %v818_v56 = vsel %vm624_vm3, %v2754_v1, %v817_v15  ;;  %v980_v5 = vrot.slane %v954_v48, 2  ;;  %v982_v23 = vrot.slane %v955_v35, 2  ;;  %v978_v4 = vsel %vm893_vm4, %v975_v44, %v977_v59  ;;  %v2758_v15 = vld [vmem:[#allocation16_spill] sm:$0xff] }
 0x130   : > { %v976_v55 = vsel %vm893_vm4, %v974_v43, %v975_v44  ;;  %v961_v12 = vmul.f32 %v2758_v15, %v2757_v29  ;;  %v987_v10 = vrot.slane %v958_v26, 2  ;;  %v1035_v40 = vstv %s2235_s8  ;;  %v2508_v43 = vpop.permute.xlu1 %1151  ;;  %v2510_v44 = vpop.permute.xlu0 %1147  ;;  %s1592_s8 = sshll.u32 %s1679_s13, 4  ;;  %s1593_s8 = int_to_ptr.vmem [resolvable:$false] %s1592_s8 }
 0x131   : > { %v983_v18 = vsel %vm893_vm4, %v980_v5, %v982_v23  ;;  %v981_v46 = vsel %vm893_vm4, %v979_v42, %v980_v5  ;;  %v1038_v57 = vstv %s2247_s9  ;;  %v1046_v50 = vmul.f32 %v1035_v40, %v1978_v13  ;;  %s1594_s9 = scalar_lea.vmem %s1593_s8, 2048 }
 0x132   : > { %833 = vrot.lane.b32.xlu0 %v818_v56, %s2729_s5  ;;  %v992_v47 = vrot.slane %v961_v12, 2  ;;  %v1047_v28 = vmul.f32 %v1035_v40, %v1981_v14  ;;  %v1048_v61 = vmul.f32 %v1035_v40, %v2051_v51  ;;  %v2759_v62 = vrot.slane %v2281_v6, 2 }
 0x133   : > { %835 = vrot.lane.b32.xlu1 %v820_v2, %s2729_s5  ;;  %v1049_v59 = vmul.f32 %v1038_v57, %v1990_v22  ;;  %v1050_v52 = vmul.f32 %v1038_v57, %v2001_v31  ;;  %v1051_v48 = vmul.f32 %v1038_v57, %v2045_v58  ;;  %v1070_v51 = vrot.slane %v1046_v50, 2  ;;  %v2761_v58 = vld [vmem:[#allocation17_spill] sm:$0xff] }
 0x134   : > { %v988_v25 = vsel %vm893_vm4, %v2759_v62, %v987_v10  ;;  %v1071_v35 = vrot.slane %v1047_v28, 2  ;;  %v1073_v6 = vrot.slane %v1048_v61, 2  ;;  %v2760_v1 = vrot.slane %v2287_v41, 2  ;;  %v2521_v42 = vpop.permute.xlu1 %1155  ;;  %v2523_v27 = vpop.permute.xlu0 %1159  ;;  %v2763_v62 = vld [vmem:[#allocation8_spill] sm:$0xff] }
 0x135   : > { %v1076_v2 = vrot.slane %v1050_v52, 2  ;;  %v1078_v31 = vrot.slane %v1051_v48, 2  ;;  %v1054_v26 = vmul.f32 %v2761_v58, %v2755_v63  ;;  %v1057_v23 = vmul.f32 %v2300_v34, %v2757_v29 }
 0x136   : > { %996 = vrot.lane.b32.xlu0 %v978_v4, %s2719_s11  ;;  %v993_v56 = vsel %vm893_vm4, %v2760_v1, %v992_v47  ;;  %v1074_v5 = vsel %vm893_vm4, %v1071_v35, %v1073_v6  ;;  %v1072_v41 = vsel %vm893_vm4, %v1070_v51, %v1071_v35  ;;  %v418_v34 = vstv %s1967_s14  ;;  %v2765_v51 = vld [vmem:[#allocation9_spill] sm:$0xff]  ;;  %v2767_v1 = vld [vmem:[#allocation11_spill] sm:$0xff]  ;;  %s2768_s14 = sshll.u32 %s1819_s22, 6 }
 0x137   : > { %994 = vrot.lane.b32.xlu1 %v976_v55, %s2719_s11  ;;  %v1079_v4 = vsel %vm893_vm4, %v1076_v2, %v1078_v31  ;;  %v1088_v12 = vrot.slane %v1057_v23, 2  ;;  %v432_v33 = vmul.f32 %v418_v34, %v1978_v13  ;;  %v2762_v50 = vstv %s1969_s27  ;;  %s2595_s27 = scalar_lea.vmem [#allocation5], %s2768_s14 }
 0x138   : > { %v2537_v63 = vpop.permute.xlu1 %1195  ;;  %v2539_v15 = vpop.permute.xlu0 %1199  ;;  %v434_v28 = vmul.f32 %v2762_v50, %v1990_v22  ;;  %v430_v35 = vstv %s1975_s7  ;;  %s1405_s7 = sshll.u32 %s1662_s18, 10  ;;  %s1252_s24 = sshll.u32 %s2595_s27, 4  ;;  %s2630_s24 = int_to_ptr.vmem [resolvable:$true] %s1252_s24 }
 0x139   : > { %s2628_s10 = scalar_lea.hbm %s2689_s4, %s1405_s7  ;;  %s1236_s18 = scalar_lea.sflag [#allocation4], %s1819_s22 }
 0x13a   : > { %1000 = vrot.lane.b32.xlu0 %v983_v18, %s2719_s11  ;;  %s1588_s12 = scalar_lea.vmem %s2630_s24, 1024  ;;  %p1595_p6 = scmp.lt.s32.totalorder %s2630_s24, %s1593_s8 }
 0x13b   : > { %998 = vrot.lane.b32.xlu1 %v981_v46, %s2719_s11  ;;  %v1089_v46 = vsel %vm893_vm4, %v1086_v53, %v1088_v12  ;;  %p1589_p8 = scmp.ne.s32.totalorder %s2630_s24, %s1588_s12  ;;  %p1596_p13 = scmp.lt.s32.totalorder %s1594_s9, %s1588_s12 }
 0x13c   : > { %v2548_v29 = vpop.permute.xlu1 %1203  ;;  %v2550_v18 = vpop.permute.xlu0 %1207 }
 0x13d   : > { %p1590_p11 = pnand %p1589_p8, %p2769_p9  ;;  %p1597_p2 = por %p1596_p13, %p1595_p6 }
 0x13e   : > { %1004 = vrot.lane.b32.xlu0 %v988_v25, %s2719_s11 }
 0x13f   : > { %1002 = vrot.lane.b32.xlu1 %v2343_v11, %s2719_s11  ;;  %v1075_v11 = vrot.slane %v1049_v59, 2  ;;  %p1591_p0 = pneg %p1590_p11 }
 0x141   : > { %v1077_v55 = vsel %vm893_vm4, %v1075_v11, %v1076_v2  ;;  %p1598_p5 = pnand %p1597_p2, %p1591_p0 }
 0x142   : > { %1008 = vrot.lane.b32.xlu0 %v993_v56, %s2719_s11  ;;  %v438_v56 = vmul.f32 %v430_v35, %v2767_v1 }
 0x143   : > { %1006 = vrot.lane.b32.xlu1 %v2348_v30, %s2719_s11  ;;  %v1083_v30 = vrot.slane %v1054_v26, 2 }
 0x145   : > { %v1084_v10 = vsel %vm893_vm4, %v1081_v21, %v1083_v30  ;;  %v433_v21 = vmul.f32 %v418_v34, %v1981_v14  ;;  %v2766_v14 = vld [vmem:[#allocation12_spill] sm:$0xff] }
 0x146   : > { %1092 = vrot.lane.b32.xlu0 %v1074_v5, %s2729_s5  ;;  %v439_v6 = vmul.f32 %v430_v35, %v2766_v14 }
 0x147   : > { %1090 = vrot.lane.b32.xlu1 %v1072_v41, %s2729_s5 }
 0x14a   : > { %1096 = vrot.lane.b32.xlu0 %v1079_v4, %s2729_s5 }
 0x14b   : > { %1094 = vrot.lane.b32.xlu1 %v1077_v55, %s2729_s5 }
 0x14e   : > { %1100 = vrot.lane.b32.xlu0 %v1084_v10, %s2729_s5 }
 0x14f   : > { %1098 = vrot.lane.b32.xlu1 %v2370_v38, %s2729_s5 }
 0x152   : > { %1104 = vrot.lane.b32.xlu0 %v1089_v46, %s2729_s5 }
 0x153   : > { %1102 = vrot.lane.b32.xlu1 %v2375_v32, %s2729_s5  ;;  %v2764_v32 = vld [vmem:[#allocation10_spill] sm:$0xff] }
 0x159   : > { %v487_v38 = vpop.permute.xlu1 %486  ;;  %v485_v40 = vpop.permute.xlu0 %484 }
 0x15a   : > { %v509_v47 = vadd.f32 %v487_v38, %v433_v21  ;;  %v508_v57 = vadd.f32 %v485_v40, %v432_v33 }
 0x15d   : > { %v489_v36 = vpop.permute.xlu0 %488 }
 0x15e   : > { %v510_v61 = vadd.f32 %v489_v36, %v434_v28 }
 0x160   : > { %v491_v53 = vpop.permute.xlu1 %490 }
 0x161   : > { %v511_v25 = vadd.f32 %v491_v53, %v2763_v62 }
 0x165   : > { %v495_v59 = vpop.permute.xlu1 %494  ;;  %v493_v52 = vpop.permute.xlu0 %492 }
 0x166   : > { %v513_v48 = vadd.f32 %v495_v59, %v2764_v32  ;;  %v512_v13 = vadd.f32 %v493_v52, %v2765_v51 }
 0x169   : > { %v499_v11 = vpop.permute.xlu1 %498  ;;  %v497_v2 = vpop.permute.xlu0 %496 }
 0x16a   : > { %v515_v31 = vadd.f32 %v499_v11, %v439_v6  ;;  %v514_v22 = vadd.f32 %v497_v2, %v438_v56 }
 0x16d   : > { %v555_v58 = vpop.permute.xlu1 %554  ;;  %v553_v26 = vpop.permute.xlu0 %552 }
 0x16e   : > { %v577_v5 = vadd.f32 %v555_v58, %v509_v47  ;;  %v576_v41 = vadd.f32 %v553_v26, %v508_v57 }
 0x170   : > { %v654_v30 = vadd.f32 %v2382_v37, %v577_v5  ;;  %v653_v23 = vadd.f32 %v2389_v60, %v576_v41 }
 0x171   : > { %v559_v4 = vpop.permute.xlu1 %558  ;;  %v557_v55 = vpop.permute.xlu0 %556 }
 0x172   : > { %v579_v12 = vadd.f32 %v559_v4, %v511_v25  ;;  %v578_v10 = vadd.f32 %v557_v55, %v510_v61 }
 0x174   : > { %v656_v34 = vadd.f32 %v2396_v9, %v579_v12  ;;  %v655_v46 = vadd.f32 %v2403_v3, %v578_v10 }
 0x175   : > { %v563_v33 = vpop.permute.xlu1 %562  ;;  %v561_v21 = vpop.permute.xlu0 %560 }
 0x176   : > { %v581_v38 = vadd.f32 %v563_v33, %v513_v48  ;;  %v580_v40 = vadd.f32 %v561_v21, %v512_v13 }
 0x178   : > { %v658_v50 = vadd.f32 %v2410_v16, %v581_v38  ;;  %v657_v47 = vadd.f32 %v2417_v54, %v580_v40 }
 0x179   : > { %v567_v57 = vpop.permute.xlu1 %566  ;;  %v565_v37 = vpop.permute.xlu0 %564 }
 0x17a   : > { %v583_v28 = vadd.f32 %v567_v57, %v515_v31  ;;  %v582_v60 = vadd.f32 %v565_v37, %v514_v22 }
 0x17c   : > { %v660_v36 = vadd.f32 %v2424_v0, %v583_v28  ;;  %v659_v61 = vadd.f32 %v2434_v20, %v582_v60 }
 0x17f   : > { %v728_v53 = vpop.permute.xlu1 %727  ;;  %v726_v9 = vpop.permute.xlu0 %725 }
 0x180   : > { %v750_v48 = vadd.f32 %v728_v53, %v654_v30  ;;  %v749_v16 = vadd.f32 %v726_v9, %v653_v23 }
 0x183   : > { %v730_v3 = vpop.permute.xlu0 %729 }
 0x184   : > { %v732_v62 = vpop.permute.xlu1 %731  ;;  %v751_v6 = vadd.f32 %v730_v3, %v655_v46 }
 0x185   : > { %v752_v14 = vadd.f32 %v732_v62, %v656_v34 }
 0x187   : > { %v734_v59 = vpop.permute.xlu0 %733 }
 0x188   : > { %v736_v25 = vpop.permute.xlu1 %735  ;;  %v753_v22 = vadd.f32 %v734_v59, %v657_v47 }
 0x189   : > { %v754_v31 = vadd.f32 %v736_v25, %v658_v50 }
 0x18c   : > { %v740_v52 = vpop.permute.xlu1 %739  ;;  %v738_v32 = vpop.permute.xlu0 %737 }
 0x18d   : > { %v756_v4 = vadd.f32 %v740_v52, %v660_v36  ;;  %v755_v55 = vadd.f32 %v738_v32, %v659_v61 }
 0x191   : > { %v822_v54 = vpop.permute.xlu0 %821 }
 0x192   : > { %v824_v51 = vpop.permute.xlu1 %823  ;;  %v845_v35 = vadd.f32 %v822_v54, %v749_v16 }
 0x193   : > { %v846_v13 = vadd.f32 %v824_v51, %v750_v48  ;;  %v1550_v51 = vld [vmem:[%s1825_s26] sm:$0xff] }
 0x194   : > { %v922_v0 = vadd.f32 %v2437_v19, %v845_v35 }
 0x195   : > { %v923_v20 = vadd.f32 %v2440_v8, %v846_v13  ;;  %v826_v56 = vpop.permute.xlu0 %825  ;;  %v1551_v13 = vld [vmem:[%s1825_s26 + $0x8] sm:$0xff] }
 0x196   : > { %v828_v1 = vpop.permute.xlu1 %827  ;;  %v847_v2 = vadd.f32 %v826_v56, %v751_v6 }
 0x197   : > { %v848_v11 = vadd.f32 %v828_v1, %v752_v14 }
 0x198   : > { %v924_v58 = vadd.f32 %v2443_v49, %v847_v2  ;;  %v1552_v2 = vld [vmem:[%s1825_s26 + $0x10] sm:$0xff] }
 0x199   : > { %v925_v26 = vadd.f32 %v2446_v7, %v848_v11 }
 0x1a0   : > { %v830_v41 = vpop.permute.xlu0 %829 }
 0x1a1   : > { %v832_v5 = vpop.permute.xlu1 %831  ;;  %v849_v23 = vadd.f32 %v830_v41, %v753_v22  ;;  %v1553_v22 = vld [vmem:[%s1825_s26 + $0x18] sm:$0xff] }
 0x1a2   : > { %v850_v30 = vadd.f32 %v832_v5, %v754_v31 }
 0x1a3   : > { %v926_v19 = vadd.f32 %v2449_v45, %v849_v23 }
 0x1a4   : > { %v927_v8 = vadd.f32 %v2452_v17, %v850_v30  ;;  %v834_v10 = vpop.permute.xlu0 %833 }
 0x1a5   : > { %v836_v12 = vpop.permute.xlu1 %835  ;;  %v851_v46 = vadd.f32 %v834_v10, %v755_v55 }
 0x1a6   : > { %v852_v34 = vadd.f32 %v836_v12, %v756_v4 }
 0x1a7   : > { %v928_v33 = vadd.f32 %v2457_v24, %v851_v46 }
 0x1a8   : > { %v929_v49 = vadd.f32 %v2460_v39, %v852_v34  ;;  %v997_v7 = vpop.permute.xlu0 %996 }
 0x1a9   : > { %v995_v21 = vpop.permute.xlu1 %994  ;;  %v1019_v45 = vadd.f32 %v997_v7, %v923_v20 }
 0x1aa   : > { %v1018_v28 = vadd.f32 %v995_v21, %v922_v0 }
 0x1ac   : > { %v1001_v40 = vpop.permute.xlu0 %1000 }
 0x1ad   : > { %v999_v38 = vpop.permute.xlu1 %998  ;;  %v1021_v24 = vadd.f32 %v1001_v40, %v925_v26 }
 0x1ae   : > { %v1020_v53 = vadd.f32 %v999_v38, %v924_v58 }
 0x1b0   : > { %v1005_v47 = vpop.permute.xlu0 %1004 }
 0x1b1   : > { %v1003_v50 = vpop.permute.xlu1 %1002  ;;  %v1023_v16 = vadd.f32 %v1005_v47, %v927_v8 }
 0x1b2   : > { %v1022_v48 = vadd.f32 %v1003_v50, %v926_v19  ;;  %v1554_v19 = vld [vmem:[%s1825_s26 + $0x20] sm:$0xff] }
 0x1b4   : > { %v1009_v37 = vpop.permute.xlu0 %1008 }
 0x1b5   : > { %v1007_v57 = vpop.permute.xlu1 %1006  ;;  %v1025_v11 = vadd.f32 %v1009_v37, %v929_v49  ;;  %v1557_v49 = vld [vmem:[%s1825_s26 + $0x38] sm:$0xff] }
 0x1b8   : > { %v1093_v17 = vpop.permute.xlu0 %1092 }
 0x1b9   : > { %v1091_v60 = vpop.permute.xlu1 %1090  ;;  %v1115_v61 = vadd.f32 %v1093_v17, %v1019_v45 }
 0x1ba   : > { %v1114_v36 = vadd.f32 %v1091_v60, %v1018_v28 }
 0x1bb   : > { %v1163_v9 = vmul.f32 %v2510_v44, %v1115_v61 }
 0x1bc   : > { %v1162_v39 = vmul.f32 %v2510_v44, %v1114_v36  ;;  %v1097_v3 = vpop.permute.xlu0 %1096 }
 0x1bd   : > { %v1095_v62 = vpop.permute.xlu1 %1094  ;;  %v1211_v59 = vadd.f32 %v2537_v63, %v1163_v9  ;;  %v1117_v32 = vadd.f32 %v1097_v3, %v1021_v24 }
 0x1be   : > { %v1210_v25 = vadd.f32 %v2537_v63, %v1162_v39  ;;  %v1116_v52 = vadd.f32 %v1095_v62, %v1020_v53 }
 0x1bf   : > { %v1219_v35 = vmax.f32 %v1551_v13, %v1211_v59  ;;  %v1165_v14 = vmul.f32 %v2508_v43, %v1117_v32 }
 0x1c0   : > { %v1218_v54 = vmax.f32 %v1550_v51, %v1210_v25  ;;  %v1164_v44 = vmul.f32 %v2508_v43, %v1116_v52  ;;  %v1101_v0 = vpop.permute.xlu0 %1100  ;;  %v1024_v43 = vadd.f32 %v1007_v57, %v928_v33 }
 0x1c1   : > { %v1099_v6 = vpop.permute.xlu1 %1098  ;;  %1228 = vst.msk [vmem:[%s2595_s27 + $0x8] sm:$0xff] %vm1226_vm5, %v1219_v35  ;;  %v1213_v20 = vadd.f32 %v2539_v15, %v1165_v14  ;;  %v1119_v56 = vadd.f32 %v1101_v0, %v1023_v16 }
 0x1c2   : > { %1227 = vst.msk [vmem:[%s2595_s27] sm:$0xff] %vm1226_vm5, %v1218_v54  ;;  %v1212_v63 = vadd.f32 %v2539_v15, %v1164_v44  ;;  %v1118_v1 = vadd.f32 %v1099_v6, %v1022_v48 }
 0x1c3   : > { %v1221_v58 = vmax.f32 %v1553_v22, %v1213_v20  ;;  %v1167_v5 = vmul.f32 %v2521_v42, %v1119_v56 }
 0x1c4   : > { %v1220_v31 = vmax.f32 %v1552_v2, %v1212_v63  ;;  %v1166_v26 = vmul.f32 %v2521_v42, %v1118_v1  ;;  %v1105_v30 = vpop.permute.xlu0 %1104  ;;  %v1555_v42 = vld [vmem:[%s1825_s26 + $0x28] sm:$0xff] }
 0x1c5   : > { %v1103_v41 = vpop.permute.xlu1 %1102  ;;  %1230 = vst.msk [vmem:[%s2595_s27 + $0x18] sm:$0xff] %vm1226_vm5, %v1221_v58  ;;  %v1215_v23 = vadd.f32 %v2548_v29, %v1167_v5  ;;  %v1121_v55 = vadd.f32 %v1105_v30, %v1025_v11 }
 0x1c6   : > { %1229 = vst.msk [vmem:[%s2595_s27 + $0x10] sm:$0xff] %vm1226_vm5, %v1220_v31  ;;  %v1214_v15 = vadd.f32 %v2548_v29, %v1166_v26  ;;  %v1120_v4 = vadd.f32 %v1103_v41, %v1024_v43 }
 0x1c7   : > { %v1223_v12 = vmax.f32 %v1555_v42, %v1215_v23  ;;  %v1169_v34 = vmul.f32 %v2523_v27, %v1121_v55 }
 0x1c8   : > { %v1222_v8 = vmax.f32 %v1554_v19, %v1214_v15  ;;  %v1168_v10 = vmul.f32 %v2523_v27, %v1120_v4  ;;  %v1556_v27 = vld [vmem:[%s1825_s26 + $0x30] sm:$0xff] }
 0x1c9   : > { %1232 = vst.msk [vmem:[%s2595_s27 + $0x28] sm:$0xff] %vm1226_vm5, %v1223_v12  ;;  %v1217_v46 = vadd.f32 %v2550_v18, %v1169_v34 }
 0x1ca   : > { %1231 = vst.msk [vmem:[%s2595_s27 + $0x20] sm:$0xff] %vm1226_vm5, %v1222_v8  ;;  %v1216_v29 = vadd.f32 %v2550_v18, %v1168_v10 }
 0x1cb   : > { %v1225_v21 = vmax.f32 %v1557_v49, %v1217_v46 }
 0x1cc   : > { %v1224_v33 = vmax.f32 %v1556_v27, %v1216_v29 }
 0x1cd   : > { %1234 = vst.msk [vmem:[%s2595_s27 + $0x38] sm:$0xff] %vm1226_vm5, %v1225_v21 }
 0x1ce   : > { %1233 = vst.msk [vmem:[%s2595_s27 + $0x30] sm:$0xff] %vm1226_vm5, %v1224_v33 }
 0x1cf   : > { %1601 = shalt.err (!%p1598_p5)
}
 0x1d0   : > { %s1602_s26 = scalar_lea.hbm %s2628_s10, 1024  ;;  %s1606_s5 = scalar_lea.hbm %s2689_s4, 2048 }
 0x1d1   : > { %p1603_p4 = scmp.ne.s32.totalorder %s2628_s10, %s1602_s26  ;;  %p1607_p12 = scmp.lt.u32.totalorder %s2628_s10, %s2689_s4 }
 0x1d2   : > { %p1608_p1 = scmp.lt.u32.totalorder %s1606_s5, %s1602_s26  ;;  %p1610_p8 = scmp.lt.u32.totalorder %s1602_s26, %s2628_s10 }
 0x1d3   : > { %p1604_p7 = pnand %p1603_p4, %p2769_p9 }
 0x1d4   : > { %p1609_p3 = por %p1608_p1, %p1607_p12 }
 0x1d5   : > { %p1605_p10 = pneg %p1604_p7 }
 0x1d6   : > { %p1611_p11 = por %p1610_p8, %p1609_p3 }
 0x1d8   : > { %p1612_p0 = pnand %p1611_p11, %p1605_p10 }
 0x1da   : > { %1615 = shalt.err (!%p1612_p0)
}
 0x1db   : > { %s1680_s7 = smov 128   ;;  %s1681_s6 = smov 8  }
 0x1dc   : > { %1480 = dma.vmem_to_hbm [thread:$0]  (%p2769_p9), %s2630_s24, 1024, %s2628_s10, %s1236_s18, %s1680_s7, %s1680_s7, %s1681_s6  }
 0x1dd PF: > { %s1267_s11 = sand.u32 1, %s1650_s15   ;;  %p2770_p6 = scmp.ne.s32.totalorder %s2709_s30, 0 }
 0x1de   : > { %p2771_p13 = scmp.ge.s32.totalorder %s1670_s20, 2  ;;  %s1268_s12 = scalar_lea.sflag [#allocation4], %s1267_s11 }
 0x1e0   : > { %p1487_p2 = pnand %p2771_p13, %p2770_p6 }
 0x1e2   : > { %1645 = dma.done.wait (!%p1487_p2), %s1268_s12, 1024  }
 0x1e3   : > { %1647 = vsyncadd (!%p1487_p2), %s1268_s12, 4294966272  ;;  %s20_s20 = sadd.s32 1, %s1670_s20   ;;  %s2772_s15 = smov %s1654_s16 }
 0x1e4   : > { %p17_p5 = scmp.ge.s32.totalorder %s20_s20, 4   ;;  %s2773_s16 = smov %s1658_s17 }
 0x1e5   : > { %s2774_s17 = smov %s1763_s29  ;;  %s2775_s18 = smov %s1666_s19 }
 0x1e6   : > { %s2776_s19 = smov %s2778_s23  ;;  %19 = sbr.rel (!%p17_p5) target bundleno = 6 (0x6), region = 90 }
 0x1ed   :  { %1273 = vsyncpa [#allocation3], 1 }
 0x1ee   :  { %1275 = vsyncpa [#allocation3 + $0x1], 1 }
 0x1ef   :  { %1276 = vsyncpa [#allocation4], 1 }
 0x1f0   :  { %1278 = vsyncpa [#allocation4 + $0x1], 1 }

</bundles_post_ra>
